<compile_context>
chip_gen: v6e
topology: v6e:2x2x1
jax: 0.10.0
libtpu: 0.0.40
codegen_flags: <defaults>
</compile_context>

<pallas_src>
import jax
import jax.numpy as jnp
from jax.experimental import pallas as pl
from jax.experimental.pallas import tpu as pltpu


def _log_kernel(x_ref, o_ref):
    # Elementwise natural log on the whole VMEM tile (EUP path).
    # Explicit f32 compute so precision is identical across v5e/v6e/v7x
    # (v5e EUP has no bf16 path); no-op for f32 inputs.
    x = x_ref[...]
    o_ref[...] = jnp.log(x.astype(jnp.float32)).astype(o_ref.dtype)


def pallas_log(x: jax.Array, *, max_block_bytes: int = 4 * 1024 * 1024) -> jax.Array:
    """Elementwise natural log via a Pallas TPU kernel.

    Works for arbitrary input shape: flattens to a lane-dense (rows, lane)
    slab, runs a tiled elementwise kernel with large blocks, reshapes back.
    Padding / slicing only happens when the element count is not already a
    multiple of 128 (or of the chosen block size for huge inputs).
    """
    orig_shape = x.shape
    dtype = x.dtype
    n = x.size
    itemsize = jnp.dtype(dtype).itemsize

    # Widest lane width (multiple of 128) that divides n exactly -> no padding
    # for the common aligned case and wide, unmasked vector stores.
    lane = 128
    for cand in (1024, 512, 256, 128):
        if n % cand == 0:
            lane = cand
            break

    x_flat = jnp.reshape(x, (-1,))

    rows = pl.cdiv(n, lane)  # rows before any row padding

    # Block row count: single block if it fits under the per-block VMEM cap
    # (kept <= ~4 MiB so double-buffered footprint stays well inside v7x's
    # 64 MiB VMEM); otherwise the largest multiple-of-8 row count under the cap.
    rows_per_block_cap = max(8, max_block_bytes // (lane * itemsize))
    if rows <= rows_per_block_cap:
        tile_rows = rows
    else:
        tile_rows = (rows_per_block_cap // 8) * 8

    rows_padded = pl.cdiv(rows, tile_rows) * tile_rows
    n_total = rows_padded * lane

    if n_total != n:
        # Pad with 1.0 so log(pad) stays finite (padded values are discarded).
        x_flat = jnp.pad(x_flat, (0, n_total - n), constant_values=1.0)

    x2d = jnp.reshape(x_flat, (rows_padded, lane))
    grid = (rows_padded // tile_rows,)

    out2d = pl.pallas_call(
        _log_kernel,
        out_shape=jax.ShapeDtypeStruct((rows_padded, lane), dtype),
        grid=grid,
        in_specs=[pl.BlockSpec((tile_rows, lane), lambda i: (i, 0))],
        out_specs=pl.BlockSpec((tile_rows, lane), lambda i: (i, 0)),
        compiler_params=pltpu.CompilerParams(
            dimension_semantics=("parallel",)
        ),
    )(x2d)

    out_flat = jnp.reshape(out2d, (-1,))
    if n_total != n:
        out_flat = out_flat[:n]
    return jnp.reshape(out_flat, orig_shape)


if __name__ == "__main__":
    key = jax.random.PRNGKey(0)
    # Small NCHW-style input, strictly positive so log is well-defined.
    x = jax.random.uniform(
        key, (2, 4, 16, 16), dtype=jnp.float32, minval=0.1, maxval=5.0
    )

    y = pallas_log(x)
    y = jax.block_until_ready(y)

    # Correctness check against plain JAX reference.
    ref = jnp.log(x)
    assert y.shape == x.shape and y.dtype == x.dtype
    assert jnp.allclose(y, ref, atol=1e-6, rtol=1e-6)

    print("KERNEL_OK")
</pallas_src>

<mosaic_0001>
module attributes {stable_mosaic.version = 11 : i64} {
  func.func @_log_kernel(%arg0: i32, %arg1: memref<2x1024xf32, #tpu.memory_space<vmem>>, %arg2: memref<2x1024xf32, #tpu.memory_space<vmem>>) attributes {dimension_semantics = [#tpu.dimension_semantics<parallel>], iteration_bounds = array<i64: 1>, scalar_prefetch = 0 : i64, scratch_operands = 0 : i64, tpu.core_type = #tpu.core_type<tc>, window_params = [{transform_indices = @transform_0, window_bounds = array<i64: 2, 1024>}, {transform_indices = @transform_1, window_bounds = array<i64: 2, 1024>}]} {
    %c0 = arith.constant 0 : index
    %c0_0 = arith.constant 0 : index
    %0 = vector.load %arg1[%c0, %c0_0] : memref<2x1024xf32, #tpu.memory_space<vmem>>, vector<2x1024xf32>
    %1 = math.log %0 : vector<2x1024xf32>
    %c0_1 = arith.constant 0 : index
    %c0_2 = arith.constant 0 : index
    %2 = vector.load %arg2[%c0_1, %c0_2] : memref<2x1024xf32, #tpu.memory_space<vmem>>, vector<2x1024xf32>
    tpu.vector_store %arg2[%c0_1, %c0_2], %1 {strides = array<i32>} : memref<2x1024xf32, #tpu.memory_space<vmem>>, vector<2x1024xf32>,
    return
  }
  func.func @transform_0(%arg0: i32) -> (i32, i32) {
    %c0_i32 = arith.constant 0 : i32
    %c0_i32_0 = arith.constant 0 : i32
    return %arg0, %c0_i32 : i32, i32
  }
  func.func @transform_1(%arg0: i32) -> (i32, i32) {
    %c0_i32 = arith.constant 0 : i32
    %c0_i32_0 = arith.constant 0 : i32
    return %arg0, %c0_i32 : i32, i32
  }
}

</mosaic_0001>

<bundles_post_ra>
// kernel: tpu_custom_call.1
= control target key start
LH: loop header
LB: loop body
LE: loop exit
PB: predicated region body
PF: predicated region fallthrough
CT: control target
= control target key end

     0   :  { %6 = vsyncpa [#allocation3], 0  ;;  %s112_s0 = inlined_call_operand.hbm [shape: f32[2,1024], index: 0, kind: input, shape index: {}]   ;;  %s113_s1 = inlined_call_operand.hbm [shape: f32[2,1024], index: 1, kind: output, shape index: {}]  }
   0x1   :  { %7 = vsyncpa [#allocation4], 0  ;;  %s94_s6 = smov [#allocation2]  }
   0x2   :  { %s14_s7 = sshll.u32 %s94_s6, 4  ;;  %s15_s7 = int_to_ptr.vmem [resolvable:$true] %s14_s7 }
   0x3   :  { %s58_s8 = scalar_lea.vmem %s15_s7, 256  ;;  %p63_p1 = scmp.lt.s32.totalorder %s15_s7, %s15_s7 }
   0x4   :  { %p59_p0 = scmp.ne.s32.totalorder %s15_s7, %s58_s8  ;;  %p64_p2 = scmp.lt.s32.totalorder %s58_s8, %s58_s8 }
   0x6   :  { %p65_p3 = por %p64_p2, %p63_p1 }
   0x8   :  { %p66_p4 = pnand %p65_p3, %p59_p0 }
   0xa   :  { %69 = shalt.err (!%p66_p4)
}
   0xb   :  { %17 = dma.hbm_to_vmem [thread:$0]  %s112_s0, 256, %s15_s7, [#allocation3]  }
   0xc   :  { %90 = dma.done.wait [#allocation3], 256  }
   0xd   :  { %91 = vsyncadd [#allocation3], 4294967040  ;;  %v21_v0 = vld [vmem:[#allocation2] sm:$0xff]  ;;  %v22_v1 = vld [vmem:[#allocation2 + $0x8] sm:$0xff]  ;;  %s95_s11 = smov [#allocation5]  }
   0xe   :  { %46 = vlog2.f32 %v21_v0  ;;  %s35_s12 = sshll.u32 %s95_s11, 4  ;;  %s36_s12 = int_to_ptr.vmem [resolvable:$true] %s35_s12 }
   0xf   :  { %48 = vlog2.f32 %v22_v1  ;;  %s70_s13 = scalar_lea.vmem %s36_s12, 256  ;;  %p75_p6 = scmp.lt.s32.totalorder %s36_s12, %s36_s12 }
  0x10   :  { %p71_p5 = scmp.ne.s32.totalorder %s36_s12, %s70_s13  ;;  %p76_p7 = scmp.lt.s32.totalorder %s70_s13, %s70_s13 }
  0x12   :  { %p77_p8 = por %p76_p7, %p75_p6 }
  0x14   :  { %p78_p9 = pnand %p77_p8, %p71_p5 }
  0x1b   :  { %v47_v2 = vpop.eup %46 }
  0x1c   :  { %v49_v3 = vpop.eup %48  ;;  %v24_v4 = vmul.f32 0.6931472, %v47_v2 }
  0x1d   :  { %v26_v5 = vmul.f32 0.6931472, %v49_v3 }
  0x1e   :  { %27 = vst [vmem:[#allocation5] sm:$0xff] %v24_v4 }
  0x1f   :  { %28 = vst [vmem:[#allocation5 + $0x8] sm:$0xff] %v26_v5 }
  0x20   :  { %81 = shalt.err (!%p78_p9)
}
  0x21   :  { %38 = dma.vmem_to_hbm [thread:$0]  %s36_s12, 256, %s113_s1, [#allocation4]  }
  0x22   :  { %92 = dma.done.wait [#allocation4], 256  }
  0x23   :  { %93 = vsyncadd [#allocation4], 4294967040 }
  0x24   :  { %42 = vsyncpa [#allocation3], 1 }
  0x25   :  { %43 = vsyncpa [#allocation4], 1 }

</bundles_post_ra>
